<compile_context>
chip_gen: v5e
topology: v5e:2x2
jax: 0.10.0
libtpu: 0.0.40
codegen_flags: <defaults>
</compile_context>

<pallas_src>
import functools

import jax
import jax.numpy as jnp
from jax.experimental import pallas as pl
from jax.experimental.pallas import tpu as pltpu


# ---- physical constants (from the PyTorch module __init__) ----
MASS = 0.468
GRAVITY = 9.81
ARM_LENGTH = 0.225
INERTIA = (0.0049, 0.0049, 0.0088)
Z_TORQUE_TO_FORCE = 1.1 / 29.0


def _quadrotor_kernel(xt_ref, ut_ref, out_ref, *, mass, gravity, arm_length,
                      inertia, kz):
    # xt_ref: (12, TB), ut_ref: (4, TB), out_ref: (12, TB); batch on lanes.
    ix, iy, iz = inertia
    inv_mass = 1.0 / mass
    inv_ix, inv_iy, inv_iz = 1.0 / ix, 1.0 / iy, 1.0 / iz

    # --- state slices (each a full lane-width row) ---
    roll = xt_ref[3:4, :]
    pitch = xt_ref[4:5, :]
    yaw = xt_ref[5:6, :]
    pos_dot = xt_ref[6:9, :]          # (3, TB) passthrough
    w0 = xt_ref[9:10, :]
    w1 = xt_ref[10:11, :]
    w2 = xt_ref[11:12, :]

    u0 = ut_ref[0:1, :]
    u1 = ut_ref[1:2, :]
    u2 = ut_ref[2:3, :]
    u3 = ut_ref[3:4, :]

    # --- thrust & torques ---
    total_thrust = u0 + u1 + u2 + u3
    torque_x = arm_length * u1 - arm_length * u3
    torque_y = -arm_length * u0 + arm_length * u2
    torque_z = kz * (u0 - u1 + u2 - u3)

    # --- third column of the rotation matrix (rpy -> R) ---
    cr = jnp.cos(roll)
    sr = jnp.sin(roll)
    cp = jnp.cos(pitch)
    sp = jnp.sin(pitch)
    cy = jnp.cos(yaw)
    sy = jnp.sin(yaw)

    r02 = cr * cy * sp + sr * sy
    r12 = cr * sp * sy - cy * sr
    r22 = cp * cr

    thrust_over_m = total_thrust * inv_mass
    pos_ddot_0 = r02 * thrust_over_m
    pos_ddot_1 = r12 * thrust_over_m
    pos_ddot_2 = r22 * thrust_over_m - gravity

    # --- omega_dot = (cross(-omega, I*omega) + torque) / I ---
    s1 = (iy - iz) * (w1 * w2)
    s2 = (iz - ix) * (w0 * w2)
    s3 = (ix - iy) * (w0 * w1)
    wdot0 = (s1 + torque_x) * inv_ix
    wdot1 = (s2 + torque_y) * inv_iy
    wdot2 = (s3 + torque_z) * inv_iz

    # --- Euler-angle rates ---
    # Exact 1/cos(pitch) (not the EUP approx) to preserve float32 accuracy.
    sec_p = 1.0 / cp
    tan_p = sp * sec_p
    rpy_dot_0 = w0 + sr * tan_p * w1 + cr * tan_p * w2
    rpy_dot_1 = cr * w1 - sr * w2
    rpy_dot_2 = sr * sec_p * w1 + cr * sec_p * w2

    # Single full-block, lane-dense store (matches torch.cat(..., dim=1) order).
    out_ref[...] = jnp.concatenate(
        [pos_dot,
         rpy_dot_0, rpy_dot_1, rpy_dot_2,
         pos_ddot_0, pos_ddot_1, pos_ddot_2,
         wdot0, wdot1, wdot2],
        axis=0,
    )


def _round_up(n, m):
    return ((n + m - 1) // m) * m


def _pick_tile(bp, max_tile):
    """Largest multiple of 128 that is <= max_tile and divides bp (bp % 128 == 0)."""
    t = min(max_tile, bp)
    t = (t // 128) * 128
    t = max(t, 128)
    while bp % t != 0:
        t -= 128
    return t


@functools.partial(jax.jit, static_argnames=("tile_b",))
def quadrotor3d_dynamics(x, u, *, tile_b=16384):
    """x: (B, 12) float32, u: (B, 4) float32 -> xdot: (B, 12) float32."""
    assert x.ndim == 2 and x.shape[1] == 12, x.shape
    assert u.ndim == 2 and u.shape[1] == 4, u.shape
    B = x.shape[0]
    dtype = x.dtype

    # Lane-dense layout: batch on the lane (last) axis.
    xt = x.T                      # (12, B)
    ut = u.T                      # (4, B)

    # Pad batch only up to the next multiple of 128 (<=127 wasted lanes), then
    # pick a tile that divides the padded batch exactly (no ragged blocks).
    Bp = _round_up(B, 128)
    if Bp != B:
        xt = jnp.pad(xt, ((0, 0), (0, Bp - B)))
        ut = jnp.pad(ut, ((0, 0), (0, Bp - B)))
    tile = _pick_tile(Bp, _round_up(tile_b, 128))

    kernel = functools.partial(
        _quadrotor_kernel,
        mass=float(MASS),
        gravity=float(GRAVITY),
        arm_length=float(ARM_LENGTH),
        inertia=tuple(float(v) for v in INERTIA),
        kz=float(Z_TORQUE_TO_FORCE),
    )

    cost = pl.CostEstimate(
        flops=60 * Bp,
        transcendentals=7 * Bp,                 # sin/cos(roll,pitch,yaw) + 1/cos_pitch
        bytes_accessed=(12 + 4 + 12) * 4 * Bp,  # x + u + out, f32
    )

    out_t = pl.pallas_call(
        kernel,
        out_shape=jax.ShapeDtypeStruct((12, Bp), dtype),
        grid=(Bp // tile,),
        in_specs=[
            pl.BlockSpec((12, tile), lambda i: (0, i)),
            pl.BlockSpec((4, tile), lambda i: (0, i)),
        ],
        out_specs=pl.BlockSpec((12, tile), lambda i: (0, i)),
        compiler_params=pltpu.CompilerParams(
            dimension_semantics=("parallel",),
        ),
        cost_estimate=cost,
    )(xt, ut)

    return out_t[:, :B].T


def quadrotor3d_dynamics_ref(x, u):
    """Pure-JAX reference mirroring the PyTorch forward line-by-line."""
    rpy = x[:, 3:6]
    pos_dot = x[:, 6:9]
    omega = x[:, 9:12]
    inertia = jnp.array(INERTIA, dtype=x.dtype)

    total_thrust = u.sum(axis=-1, keepdims=True)
    torque_x = ARM_LENGTH * u[:, 1:2] - ARM_LENGTH * u[:, 3:4]
    torque_y = -ARM_LENGTH * u[:, 0:1] + ARM_LENGTH * u[:, 2:3]
    torque_z = Z_TORQUE_TO_FORCE * (u[:, 0:1] - u[:, 1:2] + u[:, 2:3] - u[:, 3:4])
    torque = jnp.concatenate([torque_x, torque_y, torque_z], axis=-1)

    cr = jnp.cos(rpy[:, 0:1]); sr = jnp.sin(rpy[:, 0:1])
    cp = jnp.cos(rpy[:, 1:2]); sp = jnp.sin(rpy[:, 1:2])
    cy = jnp.cos(rpy[:, 2:3]); sy = jnp.sin(rpy[:, 2:3])
    r02 = cr * cy * sp + sr * sy
    r12 = cr * sp * sy - cy * sr
    r22 = cp * cr

    pos_ddot_0 = r02 * total_thrust / MASS
    pos_ddot_1 = r12 * total_thrust / MASS
    pos_ddot_2 = r22 * total_thrust / MASS - GRAVITY

    a = -omega
    b = inertia * omega
    s1 = a[:, 1:2] * b[:, 2:3] - a[:, 2:3] * b[:, 1:2]
    s2 = a[:, 2:3] * b[:, 0:1] - a[:, 0:1] * b[:, 2:3]
    s3 = a[:, 0:1] * b[:, 1:2] - a[:, 1:2] * b[:, 0:1]
    omega_dot = (jnp.concatenate([s1, s2, s3], axis=-1) + torque) / inertia

    tan_p = jnp.tan(rpy[:, 1:2])
    w0 = omega[:, 0:1]; w1 = omega[:, 1:2]; w2 = omega[:, 2:3]
    rpy_dot_0 = w0 + sr * tan_p * w1 + cr * tan_p * w2
    rpy_dot_1 = cr * w1 - sr * w2
    rpy_dot_2 = sr / cp * w1 + cr / cp * w2

    return jnp.concatenate(
        [pos_dot, rpy_dot_0, rpy_dot_1, rpy_dot_2,
         pos_ddot_0, pos_ddot_1, pos_ddot_2, omega_dot], axis=-1)


if __name__ == "__main__":
    key = jax.random.PRNGKey(0)
    kx, ku = jax.random.split(key)
    B = 256
    # Keep rpy in [-1, 1] so cos(pitch) stays well away from zero.
    x = jax.random.uniform(kx, (B, 12), dtype=jnp.float32, minval=-1.0, maxval=1.0)
    hover = MASS * GRAVITY / 4.0
    u = hover + 0.5 * jax.random.uniform(ku, (B, 4), dtype=jnp.float32,
                                         minval=-1.0, maxval=1.0)

    out = quadrotor3d_dynamics(x, u)
    out = jax.block_until_ready(out)

    ref = quadrotor3d_dynamics_ref(x, u)
    assert out.shape == (B, 12) and out.dtype == jnp.float32
    assert jnp.allclose(out, ref, atol=1e-5, rtol=1e-5), (out, ref)

    print("KERNEL_OK")
</pallas_src>

<mosaic_0001>
module attributes {stable_mosaic.version = 11 : i64} {
  func.func @_quadrotor_kernel(%arg0: i32, %arg1: memref<12x256xf32, #tpu.memory_space<vmem>>, %arg2: memref<4x256xf32, #tpu.memory_space<vmem>>, %arg3: memref<12x256xf32, #tpu.memory_space<vmem>>) attributes {dimension_semantics = [#tpu.dimension_semantics<parallel>], iteration_bounds = array<i64: 1>, scalar_prefetch = 0 : i64, scratch_operands = 0 : i64, tpu.core_type = #tpu.core_type<tc>, window_params = [{transform_indices = @transform_0, window_bounds = array<i64: 12, 256>}, {transform_indices = @transform_1, window_bounds = array<i64: 4, 256>}, {transform_indices = @transform_2, window_bounds = array<i64: 12, 256>}]} {
    %c3 = arith.constant 3 : index
    %c0 = arith.constant 0 : index
    %0 = vector.load %arg1[%c3, %c0] : memref<12x256xf32, #tpu.memory_space<vmem>>, vector<1x256xf32>
    %c4 = arith.constant 4 : index
    %c0_0 = arith.constant 0 : index
    %1 = vector.load %arg1[%c4, %c0_0] : memref<12x256xf32, #tpu.memory_space<vmem>>, vector<1x256xf32>
    %c5 = arith.constant 5 : index
    %c0_1 = arith.constant 0 : index
    %2 = vector.load %arg1[%c5, %c0_1] : memref<12x256xf32, #tpu.memory_space<vmem>>, vector<1x256xf32>
    %c6 = arith.constant 6 : index
    %c0_2 = arith.constant 0 : index
    %3 = vector.load %arg1[%c6, %c0_2] : memref<12x256xf32, #tpu.memory_space<vmem>>, vector<3x256xf32>
    %c9 = arith.constant 9 : index
    %c0_3 = arith.constant 0 : index
    %4 = vector.load %arg1[%c9, %c0_3] : memref<12x256xf32, #tpu.memory_space<vmem>>, vector<1x256xf32>
    %c10 = arith.constant 10 : index
    %c0_4 = arith.constant 0 : index
    %5 = vector.load %arg1[%c10, %c0_4] : memref<12x256xf32, #tpu.memory_space<vmem>>, vector<1x256xf32>
    %c11 = arith.constant 11 : index
    %c0_5 = arith.constant 0 : index
    %6 = vector.load %arg1[%c11, %c0_5] : memref<12x256xf32, #tpu.memory_space<vmem>>, vector<1x256xf32>
    %c0_6 = arith.constant 0 : index
    %c0_7 = arith.constant 0 : index
    %7 = vector.load %arg2[%c0_6, %c0_7] : memref<4x256xf32, #tpu.memory_space<vmem>>, vector<1x256xf32>
    %c1 = arith.constant 1 : index
    %c0_8 = arith.constant 0 : index
    %8 = vector.load %arg2[%c1, %c0_8] : memref<4x256xf32, #tpu.memory_space<vmem>>, vector<1x256xf32>
    %c2 = arith.constant 2 : index
    %c0_9 = arith.constant 0 : index
    %9 = vector.load %arg2[%c2, %c0_9] : memref<4x256xf32, #tpu.memory_space<vmem>>, vector<1x256xf32>
    %c3_10 = arith.constant 3 : index
    %c0_11 = arith.constant 0 : index
    %10 = vector.load %arg2[%c3_10, %c0_11] : memref<4x256xf32, #tpu.memory_space<vmem>>, vector<1x256xf32>
    %11 = arith.addf %7, %8 : vector<1x256xf32>
    %12 = arith.addf %11, %9 : vector<1x256xf32>
    %13 = arith.addf %12, %10 : vector<1x256xf32>
    %cst = arith.constant 2.250000e-01 : f32
    %14 = vector.broadcast %cst : f32 to vector<1x256xf32>
    %15 = arith.mulf %14, %8 : vector<1x256xf32>
    %cst_12 = arith.constant 2.250000e-01 : f32
    %16 = vector.broadcast %cst_12 : f32 to vector<1x256xf32>
    %17 = arith.mulf %16, %10 : vector<1x256xf32>
    %18 = arith.subf %15, %17 : vector<1x256xf32>
    %cst_13 = arith.constant -2.250000e-01 : f32
    %19 = vector.broadcast %cst_13 : f32 to vector<1x256xf32>
    %20 = arith.mulf %19, %7 : vector<1x256xf32>
    %cst_14 = arith.constant 2.250000e-01 : f32
    %21 = vector.broadcast %cst_14 : f32 to vector<1x256xf32>
    %22 = arith.mulf %21, %9 : vector<1x256xf32>
    %23 = arith.addf %20, %22 : vector<1x256xf32>
    %24 = arith.subf %7, %8 : vector<1x256xf32>
    %25 = arith.addf %24, %9 : vector<1x256xf32>
    %26 = arith.subf %25, %10 : vector<1x256xf32>
    %cst_15 = arith.constant 0.0379310362 : f32
    %27 = vector.broadcast %cst_15 : f32 to vector<1x256xf32>
    %28 = arith.mulf %27, %26 : vector<1x256xf32>
    %29 = math.cos %0 : vector<1x256xf32>
    %30 = math.sin %0 : vector<1x256xf32>
    %31 = math.cos %1 : vector<1x256xf32>
    %32 = math.sin %1 : vector<1x256xf32>
    %33 = math.cos %2 : vector<1x256xf32>
    %34 = math.sin %2 : vector<1x256xf32>
    %35 = arith.mulf %29, %33 : vector<1x256xf32>
    %36 = arith.mulf %35, %32 : vector<1x256xf32>
    %37 = arith.mulf %30, %34 : vector<1x256xf32>
    %38 = arith.addf %36, %37 : vector<1x256xf32>
    %39 = arith.mulf %29, %32 : vector<1x256xf32>
    %40 = arith.mulf %39, %34 : vector<1x256xf32>
    %41 = arith.mulf %33, %30 : vector<1x256xf32>
    %42 = arith.subf %40, %41 : vector<1x256xf32>
    %43 = arith.mulf %31, %29 : vector<1x256xf32>
    %cst_16 = arith.constant 2.13675213 : f32
    %44 = vector.broadcast %cst_16 : f32 to vector<1x256xf32>
    %45 = arith.mulf %13, %44 : vector<1x256xf32>
    %46 = arith.mulf %38, %45 : vector<1x256xf32>
    %47 = arith.mulf %42, %45 : vector<1x256xf32>
    %48 = arith.mulf %43, %45 : vector<1x256xf32>
    %cst_17 = arith.constant 9.810000e+00 : f32
    %49 = vector.broadcast %cst_17 : f32 to vector<1x256xf32>
    %50 = arith.subf %48, %49 : vector<1x256xf32>
    %51 = arith.mulf %5, %6 : vector<1x256xf32>
    %cst_18 = arith.constant -3.900000e-03 : f32
    %52 = vector.broadcast %cst_18 : f32 to vector<1x256xf32>
    %53 = arith.mulf %52, %51 : vector<1x256xf32>
    %54 = arith.mulf %4, %6 : vector<1x256xf32>
    %cst_19 = arith.constant 3.900000e-03 : f32
    %55 = vector.broadcast %cst_19 : f32 to vector<1x256xf32>
    %56 = arith.mulf %55, %54 : vector<1x256xf32>
    %57 = arith.mulf %4, %5 : vector<1x256xf32>
    %cst_20 = arith.constant 0.000000e+00 : f32
    %58 = vector.broadcast %cst_20 : f32 to vector<1x256xf32>
    %59 = arith.mulf %58, %57 : vector<1x256xf32>
    %60 = arith.addf %53, %18 : vector<1x256xf32>
    %cst_21 = arith.constant 204.081635 : f32
    %61 = vector.broadcast %cst_21 : f32 to vector<1x256xf32>
    %62 = arith.mulf %60, %61 : vector<1x256xf32>
    %63 = arith.addf %56, %23 : vector<1x256xf32>
    %cst_22 = arith.constant 204.081635 : f32
    %64 = vector.broadcast %cst_22 : f32 to vector<1x256xf32>
    %65 = arith.mulf %63, %64 : vector<1x256xf32>
    %66 = arith.addf %59, %28 : vector<1x256xf32>
    %cst_23 = arith.constant 113.63636 : f32
    %67 = vector.broadcast %cst_23 : f32 to vector<1x256xf32>
    %68 = arith.mulf %66, %67 : vector<1x256xf32>
    %cst_24 = arith.constant 1.000000e+00 : f32
    %69 = vector.broadcast %cst_24 : f32 to vector<1x256xf32>
    %70 = arith.divf %69, %31 : vector<1x256xf32>
    %71 = arith.mulf %32, %70 : vector<1x256xf32>
    %72 = arith.mulf %30, %71 : vector<1x256xf32>
    %73 = arith.mulf %72, %5 : vector<1x256xf32>
    %74 = arith.addf %4, %73 : vector<1x256xf32>
    %75 = arith.mulf %29, %71 : vector<1x256xf32>
    %76 = arith.mulf %75, %6 : vector<1x256xf32>
    %77 = arith.addf %74, %76 : vector<1x256xf32>
    %78 = arith.mulf %29, %5 : vector<1x256xf32>
    %79 = arith.mulf %30, %6 : vector<1x256xf32>
    %80 = arith.subf %78, %79 : vector<1x256xf32>
    %81 = arith.mulf %30, %70 : vector<1x256xf32>
    %82 = arith.mulf %81, %5 : vector<1x256xf32>
    %83 = arith.mulf %29, %70 : vector<1x256xf32>
    %84 = arith.mulf %83, %6 : vector<1x256xf32>
    %85 = arith.addf %82, %84 : vector<1x256xf32>
    %86 = tpu.concatenate %3, %77, %80, %85, %46, %47, %50, %62, %65, %68 in 0 : vector<3x256xf32>, vector<1x256xf32>, vector<1x256xf32>, vector<1x256xf32>, vector<1x256xf32>, vector<1x256xf32>, vector<1x256xf32>, vector<1x256xf32>, vector<1x256xf32>, vector<1x256xf32> -> vector<12x256xf32>
    %c0_25 = arith.constant 0 : index
    %c0_26 = arith.constant 0 : index
    %87 = vector.load %arg3[%c0_25, %c0_26] : memref<12x256xf32, #tpu.memory_space<vmem>>, vector<12x256xf32>
    tpu.vector_store %arg3[%c0_25, %c0_26], %86 {strides = array<i32>} : memref<12x256xf32, #tpu.memory_space<vmem>>, vector<12x256xf32>,
    return
  }
  func.func @transform_0(%arg0: i32) -> (i32, i32) {
    %c0_i32 = arith.constant 0 : i32
    %c0_i32_0 = arith.constant 0 : i32
    return %c0_i32, %arg0 : i32, i32
  }
  func.func @transform_1(%arg0: i32) -> (i32, i32) {
    %c0_i32 = arith.constant 0 : i32
    %c0_i32_0 = arith.constant 0 : i32
    return %c0_i32, %arg0 : i32, i32
  }
  func.func @transform_2(%arg0: i32) -> (i32, i32) {
    %c0_i32 = arith.constant 0 : i32
    %c0_i32_0 = arith.constant 0 : i32
    return %c0_i32, %arg0 : i32, i32
  }
}

</mosaic_0001>

<bundles_post_ra>
// kernel: quadrotor3d_dynamics.1
= control target key start
LH: loop header
LB: loop body
LE: loop exit
PB: predicated region body
PF: predicated region fallthrough
CT: control target
= control target key end

     0   :  { %7 = vsyncpa [#allocation3], 0  ;;  %s1781_s0 = inlined_call_operand.hbm [shape: f32[12,256], index: 0, kind: input, shape index: {}]   ;;  %s1782_s1 = inlined_call_operand.hbm [shape: f32[4,256], index: 1, kind: input, shape index: {}]   ;;  %s1783_s2 = inlined_call_operand.hbm [shape: f32[12,256], index: 2, kind: output, shape index: {}]  }
   0x1   :  { %8 = vsyncpa [#allocation6], 0 }
   0x2   :  { %9 = vsyncpa [#allocation4], 0  ;;  %s14_s11 = sshll.u32 %s1781_s0, 4  ;;  %s1276_s12 = smov [#allocation2]   ;;  %s15_s11 = int_to_ptr.hbm [resolvable:$true] %s14_s11 }
   0x3   :  { %s16_s13 = sshll.u32 %s1276_s12, 4  ;;  %s28_s16 = sshll.u32 %s1782_s1, 4  ;;  %s17_s13 = int_to_ptr.vmem [resolvable:$true] %s16_s13  ;;  %s29_s16 = int_to_ptr.hbm [resolvable:$true] %s28_s16 }
   0x4   :  { %s1277_s17 = smov 256   ;;  %s1278_s18 = smov 16  }
   0x5   :  { %22 = dma.hbm_to_vmem [thread:$0]  %s15_s11, 512, %s17_s13, [#allocation3], %s1277_s17, %s1277_s17, %s1278_s18  }
   0x6   :  { %s1279_s19 = smov [#allocation5]  }
   0x7   :  { %s30_s20 = sshll.u32 %s1279_s19, 4  ;;  %s31_s20 = int_to_ptr.vmem [resolvable:$true] %s30_s20 }
   0x8   :  { %33 = dma.hbm_to_vmem [thread:$0]  %s29_s16, 128, %s31_s20, [#allocation6]  }
   0x9   :  { %1270 = dma.done.wait [#allocation3], 512  }
   0xa   :  { %1271 = vsyncadd [#allocation3], 4294966784 }
   0xb   :  { %1272 = dma.done.wait [#allocation6], 128  }
   0xc   :  { %1273 = vsyncadd [#allocation6], 4294967168  ;;  %v1312_v0 = vld [vmem:[#allocation2 + $0x3] ss:$8 sm:$0x3]  ;;  %s1287_s0 = smov [#allocation7]  }
   0xd   :  { %v1314_v1 = vld [vmem:[#allocation2 + $0x4] ss:$8 sm:$0x3]  ;;  %v81_v2 = vand.u32 2139095040, %v1312_v0  ;;  %v78_v3 = vand.u32 2147483647, %v1312_v0 }
   0xe   :  { %v387_v5 = vand.u32 2147483647, %v1314_v1  ;;  %v390_v6 = vand.u32 2139095040, %v1314_v1  ;;  %v1280_v21 = vmov 683565275   ;;  %s1149_s1 = sshll.u32 %s1287_s0, 4  ;;  %s1150_s1 = int_to_ptr.vmem [resolvable:$true] %s1149_s1 }
   0xf   :  { %v82_v4 = vshrl.u32 %v81_v2, 23  ;;  %v85_v8 = vand.u32 8388607, %v78_v3  ;;  %v1281_v23 = vmov 2475754826   ;;  %s1151_s23 = sshll.u32 %s1783_s2, 4  ;;  %s1152_s23 = int_to_ptr.hbm [resolvable:$true] %s1151_s23 }
  0x10   :  { %v391_v9 = vshrl.u32 %v390_v6, 23  ;;  %v394_v13 = vand.u32 8388607, %v387_v5  ;;  %v1282_v25 = vmov 2131351028  }
  0x11   :  { %v1165_v7 = vadd.s32 4294967169, %v82_v4  ;;  %v86_v11 = vor.u32 8388608, %v85_v8  ;;  %v1283_v27 = vmov 2102212464   ;;  %v1284_v29 = vmov 920167782  }
  0x12   :  { %v1171_v12 = vadd.s32 4294967169, %v391_v9  ;;  %v395_v19 = vor.u32 8388608, %v394_v13  ;;  %v1285_v37 = vmov 1326507024  }
  0x13   :  { %v88_v10 = vadd.s32 1, %v1165_v7  ;;  %v1324_v15 = vshll.u32 %v86_v11, 8 }
  0x14   :  { %v397_v16 = vadd.s32 1, %v1171_v12  ;;  %v1351_v60 = vshll.u32 %v395_v19, 8 }
  0x15   :  { %vm89_vm0 = vcmp.gt.s32.totalorder %v88_v10, 0  ;;  %v127_v31 = vand.u32 65535, %v1324_v15  ;;  %v128_v51 = vshrl.u32 %v1324_v15, 16 }
  0x16   :  { %v90_v14 = vsel %vm89_vm0, %v88_v10, 0  ;;  %vm398_vm1 = vcmp.gt.s32.totalorder %v397_v16, 0 }
  0x17   :  { %v91_v17 = vshrl.u32 %v90_v14, 5  ;;  %v92_v18 = vand.u32 31, %v90_v14  ;;  %v399_v42 = vsel %vm398_vm1, %v397_v16, 0 }
  0x18   :  { %v1338_v45 = vand.u32 31, %v399_v42  ;;  %v1349_v59 = vshrl.u32 %v399_v42, 5 }
  0x19   :  { %v93_v20 = vsub.s32 32, %v92_v18  ;;  %v95_v22 = vshll.u32 %v1280_v21, %v92_v18  ;;  %v98_v24 = vshll.u32 %v1281_v23, %v92_v18  ;;  %v101_v26 = vshll.u32 %v1282_v25, %v92_v18 }
  0x1a   :  { %v104_v28 = vshll.u32 %v1283_v27, %v92_v18  ;;  %v107_v30 = vshll.u32 %v1284_v29, %v92_v18  ;;  %vm110_vm2 = vcmp.lt.s32.totalorder %v91_v17, 1  ;;  %vm113_vm3 = vcmp.lt.s32.totalorder %v91_v17, 4 }
  0x1b   :  { %v96_v32 = vshrl.u32 %v1281_v23, %v93_v20  ;;  %v99_v33 = vshrl.u32 %v1282_v25, %v93_v20  ;;  %v102_v34 = vshrl.u32 %v1283_v27, %v93_v20  ;;  %v94_v35 = vshrl.u32 %v1280_v21, %v93_v20 }
  0x1c   :  { %v105_v36 = vshrl.u32 %v1284_v29, %v93_v20  ;;  %v108_v38 = vshrl.u32 %v1285_v37, %v93_v20  ;;  %vm112_vm4 = vcmp.lt.s32.totalorder %v91_v17, 3  ;;  %vm111_vm5 = vcmp.lt.s32.totalorder %v91_v17, 2 }
  0x1d   :  { %v97_v39 = vor.u32 %v96_v32, %v95_v22  ;;  %v100_v40 = vor.u32 %v99_v33, %v98_v24  ;;  %v103_v41 = vor.u32 %v102_v34, %v101_v26  ;;  %v1344_v52 = vsub.s32 32, %v1338_v45 }
  0x1e   :  { %v106_v43 = vor.u32 %v105_v36, %v104_v28  ;;  %v109_v44 = vor.u32 %v108_v38, %v107_v30  ;;  %v404_v6 = vshll.u32 %v1280_v21, %v1338_v45  ;;  %v407_v8 = vshll.u32 %v1281_v23, %v1338_v45 }
  0x1f   :  { %v115_v46 = vsel %vm113_vm3, %v103_v41, 2102212464  ;;  %v118_v47 = vsel %vm110_vm2, %v97_v39, %v100_v40  ;;  %v122_v48 = vsel %vm110_vm2, %v100_v40, %v103_v41  ;;  %v114_v53 = vsel %vm110_vm2, %v94_v35, %v97_v39 }
  0x20   :  { %v119_v49 = vsel %vm113_vm3, %v106_v43, 920167782  ;;  %v123_v50 = vsel %vm113_vm3, %v109_v44, 1326507024  ;;  %v116_v54 = vsel %vm112_vm4, %v100_v40, %v115_v46  ;;  %v405_v7 = vshrl.u32 %v1281_v23, %v1344_v52 }
  0x21   :  { %v120_v55 = vsel %vm112_vm4, %v103_v41, %v119_v49  ;;  %v124_v56 = vsel %vm112_vm4, %v106_v43, %v123_v50  ;;  %v1354_v4 = vsel %vm111_vm5, %v114_v53, %v116_v54  ;;  %v408_v12 = vshrl.u32 %v1282_v25, %v1344_v52 }
  0x22   :  { %v121_v57 = vsel %vm111_vm5, %v118_v47, %v120_v55  ;;  %v125_v58 = vsel %vm111_vm5, %v122_v48, %v124_v56  ;;  %v410_v17 = vshll.u32 %v1282_v25, %v1338_v45  ;;  %v1286_v35 = vmov 0  }
  0x23   :  { %v129_v61 = vand.u32 65535, %v125_v58  ;;  %v130_v62 = vshrl.u32 %v125_v58, 16  ;;  %v151_v63 = vand.u32 65535, %v121_v57  ;;  %v152_v2 = vshrl.u32 %v121_v57, 16 }
  0x24   :  { %v411_v38 = vshrl.u32 %v1283_v27, %v1344_v52  ;;  %v413_v41 = vshll.u32 %v1283_v27, %v1338_v45  ;;  %v1373_v44 = vor.u32 %v405_v7, %v404_v6  ;;  %v1376_v48 = vor.u32 %v408_v12, %v407_v8 }
  0x25   :  { %v131_v9 = vmul.u32 %v129_v61, %v127_v31  ;;  %v132_v10 = vmul.u32 %v130_v62, %v127_v31  ;;  %v133_v11 = vmul.u32 %v129_v61, %v128_v51  ;;  %v153_v13 = vmul.u32 %v151_v63, %v127_v31 }
  0x26   :  { %v154_v14 = vmul.u32 %v152_v2, %v127_v31  ;;  %v155_v16 = vmul.u32 %v151_v63, %v128_v51  ;;  %v134_v18 = vmul.u32 %v130_v62, %v128_v51  ;;  %v156_v22 = vmul.u32 %v152_v2, %v128_v51 }
  0x27   :  { %v135_v19 = vshll.u32 %v132_v10, 16  ;;  %v137_v20 = vshll.u32 %v133_v11, 16  ;;  %v136_v24 = vshrl.u32 %v132_v10, 16  ;;  %v138_v26 = vshrl.u32 %v133_v11, 16 }
  0x28   :  { %v157_v28 = vshll.u32 %v154_v14, 16  ;;  %v159_v30 = vshll.u32 %v155_v16, 16  ;;  %v158_v33 = vshrl.u32 %v154_v14, 16  ;;  %v160_v34 = vshrl.u32 %v155_v16, 16 }
  0x29   :  { %vm139_vm6 = vc.u32 %v131_v9, %v135_v19  ;;  %v141_v32 = vadd.s32 %v135_v19, %v131_v9  ;;  %v414_v49 = vshrl.u32 %v1284_v29, %v1344_v52  ;;  %v416_v53 = vshll.u32 %v1284_v29, %v1338_v45 }
  0x2a   :  { %v140_v36 = vsel %vm139_vm6, 1, %v1286_v35  ;;  %vm161_vm7 = vc.u32 %v153_v13, %v157_v28  ;;  %v163_v31 = vadd.s32 %v157_v28, %v153_v13  ;;  %v417_v54 = vshrl.u32 %v1285_v37, %v1344_v52 }
  0x2b   :  { %v142_v39 = vadd.s32 %v140_v36, %v134_v18  ;;  %vm143_vm8 = vc.u32 %v141_v32, %v137_v20  ;;  %v162_v40 = vsel %vm161_vm7, 1, %v1286_v35  ;;  %v412_v56 = vor.u32 %v411_v38, %v410_v17 }
  0x2c   :  { %v144_v42 = vsel %vm143_vm8, 1, %v1286_v35  ;;  %v164_v43 = vadd.s32 %v162_v40, %v156_v22  ;;  %vm165_vm9 = vc.u32 %v163_v31, %v159_v30  ;;  %v1380_v50 = vadd.s32 %v163_v31, %v159_v30 }
  0x2d   :  { %v146_v46 = vadd.s32 %v144_v42, %v142_v39  ;;  %v166_v47 = vsel %vm165_vm9, 1, %v1286_v35  ;;  %v415_v57 = vor.u32 %v414_v49, %v413_v41  ;;  %vm419_vm10 = vcmp.lt.s32.totalorder %v1349_v59, 1 }
  0x2e   :  { %v168_v51 = vadd.s32 %v166_v47, %v164_v43  ;;  %v418_v61 = vor.u32 %v417_v54, %v416_v53  ;;  %vm421_vm11 = vcmp.lt.s32.totalorder %v1349_v59, 3  ;;  %vm422_vm12 = vcmp.lt.s32.totalorder %v1349_v59, 4 }
  0x2f   :  { %v147_v55 = vadd.s32 %v146_v46, %v136_v24  ;;  %vm420_vm13 = vcmp.lt.s32.totalorder %v1349_v59, 2  ;;  %v427_v45 = vsel %vm419_vm10, %v1373_v44, %v1376_v48  ;;  %v428_v2 = vsel %vm422_vm12, %v415_v57, 920167782 }
  0x30   :  { %v169_v58 = vadd.s32 %v168_v51, %v158_v33  ;;  %v171_v6 = vmul.u32 %v1324_v15, %v1354_v4  ;;  %v429_v7 = vsel %vm421_vm11, %v412_v56, %v428_v2  ;;  %v436_v8 = vand.u32 65535, %v1351_v60 }
  0x31   :  { %v1389_v62 = vadd.s32 %v147_v55, %v138_v26  ;;  %v430_v10 = vsel %vm420_vm13, %v427_v45, %v429_v7  ;;  %v431_v11 = vsel %vm419_vm10, %v1376_v48, %v412_v56  ;;  %v432_v12 = vsel %vm422_vm12, %v418_v61, 1326507024 }
  0x32   :  { %v170_v63 = vadd.s32 %v169_v58, %v160_v34  ;;  %v433_v15 = vsel %vm421_vm11, %v415_v57, %v432_v12  ;;  %v437_v4 = vshrl.u32 %v1351_v60, 16  ;;  %v460_v13 = vand.u32 65535, %v430_v10  ;;  %v1417_v34 = vld [vmem:[#allocation2 + $0x5] ss:$8 sm:$0x3] }
  0x33   :  { %vm173_vm14 = vc.u32 %v1389_v62, %v1380_v50  ;;  %v461_v14 = vshrl.u32 %v430_v10, 16  ;;  %v434_v17 = vsel %vm420_vm13, %v431_v11, %v433_v15  ;;  %v403_v36 = vshrl.u32 %v1280_v21, %v1344_v52 }
  0x34   :  { %v174_v9 = vadd.s32 1, %v170_v63  ;;  %v438_v19 = vand.u32 65535, %v434_v17  ;;  %v439_v20 = vshrl.u32 %v434_v17, 16  ;;  %v462_v22 = vmul.u32 %v460_v13, %v436_v8 }
  0x35   :  { %v463_v24 = vmul.u32 %v461_v14, %v436_v8  ;;  %v464_v26 = vmul.u32 %v460_v13, %v437_v4  ;;  %v424_v43 = vsel %vm422_vm12, %v412_v56, 2102212464  ;;  %v465_v46 = vmul.u32 %v461_v14, %v437_v4 }
  0x36   :  { %v175_v16 = vsel %vm173_vm14, %v174_v9, %v170_v63  ;;  %v440_v30 = vmul.u32 %v438_v19, %v436_v8  ;;  %v441_v32 = vmul.u32 %v439_v20, %v436_v8  ;;  %v442_v33 = vmul.u32 %v438_v19, %v437_v4 }
  0x37   :  { %v176_v18 = vadd.s32 %v175_v16, %v171_v6  ;;  %v466_v31 = vshll.u32 %v463_v24, 16  ;;  %v468_v38 = vshll.u32 %v464_v26, 16  ;;  %v443_v40 = vmul.u32 %v439_v20, %v437_v4 }
  0x38   :  { %v444_v41 = vshll.u32 %v441_v32, 16  ;;  %v446_v42 = vshll.u32 %v442_v33, 16  ;;  %v699_v53 = vand.u32 2139095040, %v1417_v34  ;;  %v467_v54 = vshrl.u32 %v463_v24, 16 }
  0x39   :  { %v177_v28 = vadd.s32 536870912, %v176_v18  ;;  %vm470_vm15 = vc.u32 %v462_v22, %v466_v31  ;;  %v472_v47 = vadd.s32 %v466_v31, %v462_v22  ;;  %v445_v58 = vshrl.u32 %v441_v32, 16 }
  0x3a   :  { %vm448_vm0 = vc.u32 %v440_v30, %v444_v41  ;;  %v450_v51 = vadd.s32 %v444_v41, %v440_v30  ;;  %v471_v55 = vsel %vm470_vm15, 1, %v1286_v35  ;;  %v447_v56 = vshrl.u32 %v442_v33, 16 }
  0x3b   :  { %v1421_v39 = vshrl.u32 %v177_v28, 30  ;;  %v449_v52 = vsel %vm448_vm0, 1, %v1286_v35  ;;  %vm474_vm1 = vc.u32 %v472_v47, %v468_v38  ;;  %v473_v45 = vadd.s32 %v471_v55, %v465_v46 }
  0x3c   :  { %v451_v61 = vadd.s32 %v449_v52, %v443_v40  ;;  %vm452_vm2 = vc.u32 %v450_v51, %v446_v42  ;;  %v475_v2 = vsel %vm474_vm1, 1, %v1286_v35  ;;  %v700_v8 = vshrl.u32 %v699_v53, 23 }
  0x3d   :  { %v179_v49 = vshll.u32 %v1421_v39, 30  ;;  %v453_v63 = vsel %vm452_vm2, 1, %v1286_v35  ;;  %v423_v9 = vsel %vm419_vm10, %v403_v36, %v1373_v44  ;;  %v425_v10 = vsel %vm421_vm11, %v1376_v48, %v424_v43 }
  0x3e   :  { %v455_v7 = vadd.s32 %v453_v63, %v451_v61  ;;  %v469_v11 = vshrl.u32 %v464_v26, 16  ;;  %v477_v12 = vadd.s32 %v475_v2, %v473_v45  ;;  %v1177_v13 = vadd.s32 4294967169, %v700_v8 }
  0x3f   :  { %v1429_v57 = vsub.s32 %v176_v18, %v179_v49  ;;  %v1442_v16 = vadd.s32 %v472_v47, %v468_v38  ;;  %v426_v18 = vsel %vm420_vm13, %v423_v9, %v425_v10  ;;  %v696_v59 = vand.u32 2147483647, %v1417_v34 }
  0x40   :  { %v456_v4 = vadd.s32 %v455_v7, %v445_v58  ;;  %v478_v17 = vadd.s32 %v477_v12, %v467_v54  ;;  %v706_v44 = vadd.s32 1, %v1177_v13  ;;  %v480_v48 = vmul.u32 %v1351_v60, %v426_v18 }
  0x41   :  { %vm181_vm3 = vcmp.lt.s32.totalorder %v1429_v57, 0  ;;  %v182_v6 = vsub.s32 0, %v1429_v57  ;;  %v703_v60 = vand.u32 8388607, %v696_v59  ;;  %v172_v41 = vadd.s32 %v1380_v50, %v1389_v62 }
  0x42   :  { %v1446_v19 = vadd.s32 %v456_v4, %v447_v56  ;;  %v479_v22 = vadd.s32 %v478_v17, %v469_v11  ;;  %vm707_vm4 = vcmp.gt.s32.totalorder %v706_v44, 0  ;;  %vm80_vm13 = vcmp.lt.s32.totalorder %v1312_v0, 0 }
  0x43   :  { %v183_v15 = vsel %vm181_vm3, %v182_v6, %v1429_v57  ;;  %v708_v26 = vsel %vm707_vm4, %v706_v44, 0  ;;  %v704_v58 = vor.u32 8388608, %v703_v60  ;;  %vm1519_vm15 = vcmp.le.f32.partialorder %v78_v3, 0.7853982 }
  0x44   :  { %v184_v14 = vclz %v183_v15  ;;  %vm482_vm6 = vc.u32 %v1446_v19, %v1442_v16  ;;  %v483_v24 = vadd.s32 1, %v479_v22  ;;  %v710_v32 = vand.u32 31, %v708_v26 }
  0x45   :  { %v1460_v46 = vshrl.u32 %v708_v26, 5  ;;  %v481_v44 = vadd.s32 %v1442_v16, %v1446_v19  ;;  %vm389_vm0 = vcmp.lt.s32.totalorder %v1314_v1, 0  ;;  %vm1534_vm2 = vcmp.le.f32.partialorder %v387_v5, 0.7853982 }
  0x46   :  { %v1166_v20 = vadd.s32 4294967294, %v184_v14  ;;  %v484_v30 = vsel %vm482_vm6, %v483_v24, %v479_v22  ;;  %v1452_v38 = vsub.s32 32, %v710_v32  ;;  %v716_v47 = vshll.u32 %v1281_v23, %v710_v32 }
  0x47   :  { %v485_v33 = vadd.s32 %v484_v30, %v480_v48  ;;  %v719_v51 = vshll.u32 %v1282_v25, %v710_v32  ;;  %v722_v54 = vshll.u32 %v1283_v27, %v710_v32  ;;  %v725_v62 = vshll.u32 %v1284_v29, %v710_v32 }
  0x48   :  { %vm1167_vm5 = vcmp.lt.s32.totalorder %v1166_v20, 0  ;;  %v717_v49 = vshrl.u32 %v1282_v25, %v1452_v38  ;;  %v720_v53 = vshrl.u32 %v1283_v27, %v1452_v38  ;;  %v723_v50 = vshrl.u32 %v1284_v29, %v1452_v38 }
  0x49   :  { %v187_v28 = vsel %vm1167_vm5, 0, %v1166_v20  ;;  %v486_v31 = vadd.s32 536870912, %v485_v33  ;;  %v726_v61 = vshrl.u32 %v1285_v37, %v1452_v38  ;;  %v713_v45 = vshll.u32 %v1280_v21, %v710_v32 }
  0x4a   :  { %v192_v36 = vsub.s32 4294967266, %v187_v28  ;;  %v188_v42 = vsub.s32 32, %v187_v28  ;;  %v189_v55 = vshll.u32 %v1429_v57, %v187_v28  ;;  %v714_v2 = vshrl.u32 %v1281_v23, %v1452_v38 }
  0x4b   :  { %v1454_v40 = vshrl.u32 %v486_v31, 30  ;;  %v1479_v27 = vor.u32 %v717_v49, %v716_v47  ;;  %v1481_v6 = vor.u32 %v720_v53, %v719_v51  ;;  %vm728_vm7 = vcmp.lt.s32.totalorder %v1460_v46, 1 }
  0x4c   :  { %v193_v43 = vadd.s32 127, %v192_v36  ;;  %v190_v56 = vshrl.u32 %v172_v41, %v188_v42  ;;  %v724_v57 = vor.u32 %v723_v50, %v722_v54  ;;  %v727_v7 = vor.u32 %v726_v61, %v725_v62 }
  0x4d   :  { %v488_v52 = vshll.u32 %v1454_v40, 30  ;;  %vm731_vm9 = vcmp.lt.s32.totalorder %v1460_v46, 4  ;;  %v1485_v37 = vshll.u32 %v704_v58, 8  ;;  %vm730_vm10 = vcmp.lt.s32.totalorder %v1460_v46, 3 }
  0x4e   :  { %v194_v25 = vshll.u32 %v193_v43, 23  ;;  %v191_v8 = vor.u32 %v190_v56, %v189_v55  ;;  %v1488_v11 = vor.u32 %v714_v2, %v713_v45  ;;  %vm729_vm11 = vcmp.lt.s32.totalorder %v1460_v46, 2 }
  0x4f   :  { %v489_v63 = vsub.s32 %v485_v33, %v488_v52  ;;  %v740_v12 = vsel %vm728_vm7, %v1479_v27, %v1481_v6  ;;  %v737_v15 = vsel %vm731_vm9, %v724_v57, 920167782  ;;  %v741_v4 = vsel %vm731_vm9, %v727_v7, 1326507024 }
  0x50   :  { %v195_v9 = vor.u32 4788187, %v194_v25  ;;  %v742_v14 = vsel %vm730_vm10, %v724_v57, %v741_v4  ;;  %v198_v18 = vcvt.s32.f32 %v191_v8  ;;  %v736_v22 = vsel %vm728_vm7, %v1488_v11, %v1479_v27 }
  0x51   :  { %vm490_vm8 = vcmp.lt.s32.totalorder %v489_v63, 0  ;;  %v491_v29 = vsub.s32 0, %v489_v63  ;;  %v743_v20 = vsel %vm729_vm11, %v740_v12, %v742_v14  ;;  %v738_v48 = vsel %vm730_vm10, %v1481_v6, %v737_v15 }
  0x52   :  { %v196_v17 = vand.u32 2147483647, %v195_v9  ;;  %v745_v24 = vand.u32 65535, %v1485_v37  ;;  %v746_v28 = vshrl.u32 %v1485_v37, 16  ;;  %v747_v30 = vand.u32 65535, %v743_v20 }
  0x53   :  { %v492_v10 = vsel %vm490_vm8, %v491_v29, %v489_v63  ;;  %v748_v16 = vshrl.u32 %v743_v20, 16  ;;  %v739_v31 = vsel %vm729_vm11, %v736_v22, %v738_v48  ;;  %v511_v20 = vsub.s32 4, %v1454_v40 }
  0x54   :  { %v493_v23 = vclz %v492_v10  ;;  %v199_v33 = vmul.f32 %v198_v18, %v196_v17  ;;  %v751_v43 = vmul.u32 %v747_v30, %v746_v28  ;;  %v749_v49 = vmul.u32 %v747_v30, %v745_v24 }
  0x55   :  { %v750_v42 = vmul.u32 %v748_v16, %v745_v24  ;;  %v770_v51 = vshrl.u32 %v739_v31, 16  ;;  %v769_v50 = vand.u32 65535, %v739_v31  ;;  %v752_v58 = vmul.u32 %v748_v16, %v746_v28 }
  0x56   :  { %v1172_v13 = vadd.s32 4294967294, %v493_v23  ;;  %v200_v53 = vxor.u32 2147483648, %v199_v33  ;;  %v755_v61 = vshll.u32 %v751_v43, 16  ;;  %v712_v17 = vshrl.u32 %v1280_v21, %v1452_v38 }
  0x57   :  { %v753_v54 = vshll.u32 %v750_v42, 16  ;;  %v772_v25 = vmul.u32 %v770_v51, %v745_v24  ;;  %v773_v57 = vmul.u32 %v769_v50, %v746_v28  ;;  %v771_v9 = vmul.u32 %v769_v50, %v745_v24 }
  0x58   :  { %vm1173_vm12 = vcmp.lt.s32.totalorder %v1172_v13, 0  ;;  %v201_v45 = vsel %vm80_vm13, %v200_v53, %v199_v33  ;;  %v754_v4 = vshrl.u32 %v750_v42, 16  ;;  %v774_v14 = vmul.u32 %v770_v51, %v746_v28 }
  0x59   :  { %v496_v26 = vsel %vm1173_vm12, 0, %v1172_v13  ;;  %vm757_vm14 = vc.u32 %v749_v49, %v753_v54  ;;  %v759_v56 = vadd.s32 %v753_v54, %v749_v49  ;;  %v1530_v3 = vsel %vm1519_vm15, %v1312_v0, %v201_v45 }
  0x5a   :  { %v497_v19 = vsub.s32 32, %v496_v26  ;;  %v498_v32 = vshll.u32 %v489_v63, %v496_v26  ;;  %v501_v36 = vsub.s32 4294967266, %v496_v26  ;;  %v758_v29 = vsel %vm757_vm14, 1, %v1286_v35 }
  0x5b   :  { %v760_v8 = vadd.s32 %v758_v29, %v752_v58  ;;  %vm761_vm1 = vc.u32 %v759_v56, %v755_v61  ;;  %v775_v12 = vshll.u32 %v772_v25, 16  ;;  %v777_v18 = vshll.u32 %v773_v57, 16 }
  0x5c   :  { %v499_v60 = vshrl.u32 %v481_v44, %v497_v19  ;;  %v502_v41 = vadd.s32 127, %v501_v36  ;;  %v762_v23 = vsel %vm761_vm1, 1, %v1286_v35  ;;  %v733_v5 = vsel %vm731_vm9, %v1481_v6, 2102212464 }
  0x5d   :  { %v764_v13 = vadd.s32 %v762_v23, %v760_v8  ;;  %vm779_vm3 = vc.u32 %v771_v9, %v775_v12  ;;  %v1549_v22 = vmul.f32 %v1530_v3, %v1530_v3  ;;  %v781_v38 = vadd.s32 %v775_v12, %v771_v9 }
  0x5e   :  { %v500_v47 = vor.u32 %v499_v60, %v498_v32  ;;  %v503_v52 = vshll.u32 %v502_v41, 23  ;;  %v780_v21 = vsel %vm779_vm3, 1, %v1286_v35  ;;  %v756_v26 = vshrl.u32 %v751_v43, 16 }
  0x5f   :  { %v765_v28 = vadd.s32 %v764_v13, %v754_v4  ;;  %v782_v30 = vadd.s32 %v780_v21, %v774_v14  ;;  %v732_v6 = vsel %vm728_vm7, %v712_v17, %v1488_v11  ;;  %v776_v16 = vshrl.u32 %v772_v25, 16  ;;  %v60_v14 = vld [vmem:[#allocation5 + $0x1] ss:$4 sm:$0x3] }
  0x60   :  { %v504_v62 = vor.u32 4788187, %v503_v52  ;;  %v507_v55 = vcvt.s32.f32 %v500_v47  ;;  %vm783_vm4 = vc.u32 %v781_v38, %v777_v18  ;;  %v734_v33 = vsel %vm730_vm10, %v1479_v27, %v733_v5 }
  0x61   :  { %v784_v36 = vsel %vm783_vm4, 1, %v1286_v35  ;;  %v214_v31 = vmul.f32 -0.00019511016, %v1549_v22  ;;  %v512_v60 = vsel %vm389_vm0, %v511_v20, %v1454_v40  ;;  %v778_v41 = vshrl.u32 %v773_v57, 16 }
  0x62   :  { %v505_v2 = vand.u32 2147483647, %v504_v62  ;;  %v786_v42 = vadd.s32 %v784_v36, %v782_v30  ;;  %v1566_v47 = vadd.s32 %v765_v28, %v756_v26  ;;  %v1568_v49 = vadd.s32 %v781_v38, %v777_v18  ;;  %v62_v28 = vld [vmem:[#allocation5 + $0x2] ss:$4 sm:$0x3] }
  0x63   :  { %v207_v51 = vmul.f32 -0.001358992, %v1549_v22  ;;  %v735_v27 = vsel %vm729_vm11, %v732_v6, %v734_v33  ;;  %v514_v53 = vsel %vm1534_vm2, 0, %v512_v60  ;;  %v215_v40 = vadd.f32 0.008332121, %v214_v31 }
  0x64   :  { %v508_v7 = vmul.f32 %v507_v55, %v505_v2  ;;  %v787_v35 = vadd.s32 %v786_v42, %v776_v16  ;;  %v789_v58 = vmul.u32 %v1485_v37, %v735_v27  ;;  %vm791_vm5 = vc.u32 %v1566_v47, %v1568_v49 }
  0x65   :  { %v208_v61 = vadd.f32 0.041655596, %v207_v51  ;;  %v531_v56 = vand.u32 3, %v514_v53  ;;  %v202_v2 = vsub.s32 4, %v1421_v39  ;;  %v216_v29 = vmul.f32 %v215_v40, %v1549_v22 }
  0x66   :  { %v509_v15 = vxor.u32 2147483648, %v508_v7  ;;  %v788_v50 = vadd.s32 %v787_v35, %v778_v41  ;;  %vm530_vm9 = vweird.f32 %v1314_v1  ;;  %v1613_v41 = vmul.f32 0.225, %v60_v14 }
  0x67   :  { %v209_v10 = vmul.f32 %v208_v61, %v1549_v22  ;;  %vm536_vm6 = vcmp.eq.s32.totalorder %v531_v56, 2  ;;  %v203_v4 = vsel %vm80_vm13, %v202_v2, %v1421_v39  ;;  %v217_v13 = vadd.f32 -0.16666654, %v216_v29 }
  0x68   :  { %v510_v44 = vsel %vm389_vm0, %v509_v15, %v508_v7  ;;  %v792_v25 = vadd.s32 1, %v788_v50  ;;  %v58_v15 = vld [vmem:[#allocation5] ss:$4 sm:$0x3]  ;;  %vm533_vm7 = vcmp.eq.s32.totalorder %v531_v56, 0  ;;  %vm532_vm8 = vcmp.lt.s32.totalorder %v531_v56, 2 }
  0x69   :  { %v513_v48 = vsel %vm1534_vm2, %v1314_v1, %v510_v44  ;;  %v210_v20 = vadd.f32 -0.4999988, %v209_v10  ;;  %v205_v5 = vsel %vm1519_vm15, 0, %v203_v4  ;;  %v65_v21 = vadd.f32 %v60_v14, %v58_v15 }
  0x6a   :  { %v515_v24 = vmul.f32 %v513_v48, %v513_v48  ;;  %v793_v57 = vsel %vm791_vm5, %v792_v25, %v788_v50  ;;  %v74_v38 = vsub.f32 %v58_v15, %v60_v14  ;;  %v376_v16 = vadd.s32 3, %v205_v5  ;;  %v1654_v14 = vld [vmem:[#allocation2 + $0x11] ss:$8 sm:$0x3] }
  0x6b   :  { %v794_v9 = vadd.s32 %v793_v57, %v789_v58  ;;  %v211_v63 = vmul.f32 %v210_v20, %v1549_v22  ;;  %v66_v36 = vadd.f32 %v65_v21, %v62_v28  ;;  %v222_v42 = vand.u32 3, %v205_v5  ;;  %v1640_v57 = vld [vmem:[#allocation2 + $0x12] ss:$8 sm:$0x3] }
  0x6c   :  { %v516_v19 = vmul.f32 -0.001358992, %v515_v24  ;;  %v523_v32 = vmul.f32 -0.00019511016, %v515_v24  ;;  %v1611_v31 = vadd.f32 %v74_v38, %v62_v28  ;;  %v1620_v51 = vand.u32 3, %v376_v16 }
  0x6d   :  { %v795_v12 = vadd.s32 536870912, %v794_v9  ;;  %v1622_v35 = vmul.f32 -0.225, %v58_v15  ;;  %vm223_vm11 = vcmp.lt.s32.totalorder %v222_v42, 2  ;;  %vm224_vm12 = vcmp.eq.s32.totalorder %v222_v42, 0 }
  0x6e   :  { %v517_v43 = vadd.f32 0.041655596, %v516_v19  ;;  %v524_v11 = vadd.f32 0.008332121, %v523_v32  ;;  %v685_v32 = vadd.s32 3, %v514_v53  ;;  %vm227_vm13 = vcmp.eq.s32.totalorder %v222_v42, 2 }
  0x6f   :  { %v1593_v44 = vshrl.u32 %v795_v12, 30  ;;  %v1609_v19 = vld [vmem:[#allocation5 + $0x3] ss:$4 sm:$0x3]  ;;  %v1624_v53 = vmul.f32 0.225, %v62_v28  ;;  %v790_v56 = vadd.s32 %v1568_v49, %v1566_v47  ;;  %vm221_vm0 = vweird.f32 %v1312_v0 }
  0x70   :  { %v518_v52 = vmul.f32 %v517_v43, %v515_v24  ;;  %v525_v54 = vmul.f32 %v524_v11, %v515_v24  ;;  %v1616_v11 = vmul.f32 0.225, %v1609_v19  ;;  %v67_v40 = vadd.f32 %v66_v36, %v1609_v19  ;;  %v1646_v47 = vld [vmem:[#allocation2 + $0x13] ss:$8 sm:$0x3] }
  0x71   :  { %v76_v50 = vsub.f32 %v1611_v31, %v1609_v19  ;;  %vm382_vm14 = vcmp.eq.s32.totalorder %v1620_v51, 2  ;;  %vm378_vm3 = vcmp.lt.s32.totalorder %v1620_v51, 2  ;;  %v1019_v38 = vmul.f32 %v1646_v47, %v1640_v57 }
  0x72   :  { %v519_v62 = vadd.f32 -0.4999988, %v518_v52  ;;  %v526_v55 = vadd.f32 -0.16666654, %v525_v54  ;;  %v686_v52 = vand.u32 3, %v685_v32  ;;  %v1021_v28 = vmul.f32 %v1646_v47, %v1654_v14 }
  0x73   :  { %v70_v36 = vsub.f32 %v1613_v41, %v1616_v11 }
  0x74   :  { %v520_v46 = vmul.f32 %v519_v62, %v515_v24  ;;  %v527_v45 = vmul.f32 %v526_v55, %v515_v24  ;;  %v218_v24 = vmul.f32 %v217_v13, %v1549_v22  ;;  %v1618_v22 = vadd.f32 1.0, %v211_v63 }
  0x75   :  { %vm688_vm1 = vcmp.eq.s32.totalorder %v686_v52, 0  ;;  %vm691_vm2 = vcmp.eq.s32.totalorder %v686_v52, 2 }
  0x76   :  { %v1580_v7 = vadd.f32 1.0, %v520_v46  ;;  %v528_v8 = vadd.f32 1.0, %v527_v45  ;;  %v219_v60 = vadd.f32 1.0, %v218_v24  ;;  %v228_v61 = vxor.u32 2147483648, %v1618_v22 }
  0x78   :  { %v1583_v37 = vmul.f32 %v528_v8, %v513_v48  ;;  %v537_v23 = vxor.u32 2147483648, %v1580_v7  ;;  %v797_v48 = vshll.u32 %v1593_v44, 30  ;;  %v220_v62 = vmul.f32 %v219_v60, %v1530_v3 }
  0x7a   :  { %v534_v17 = vxor.u32 2147483648, %v1583_v37  ;;  %v538_v18 = vsel %vm536_vm6, %v537_v23, %v1583_v37  ;;  %v798_v6 = vsub.s32 %v794_v9, %v797_v48  ;;  %v225_v46 = vxor.u32 2147483648, %v220_v62 }
  0x7b   :  { %v229_v8 = vsel %vm227_vm13, %v228_v61, %v220_v62  ;;  %vm379_vm6 = vcmp.eq.s32.totalorder %v1620_v51, 0  ;;  %v693_v20 = vsel %vm691_vm2, %v537_v23, %v1583_v37 }
  0x7c   :  { %v535_v39 = vsel %vm533_vm7, %v1580_v7, %v534_v17  ;;  %vm799_vm10 = vcmp.lt.s32.totalorder %v798_v6, 0  ;;  %v800_v33 = vsub.s32 0, %v798_v6  ;;  %v226_v49 = vsel %vm224_vm12, %v1618_v22, %v225_v46 }
  0x7d   :  { %v539_v26 = vsel %vm532_vm8, %v535_v39, %v538_v18  ;;  %vm687_vm7 = vcmp.lt.s32.totalorder %v686_v52, 2  ;;  %v690_v18 = vsel %vm688_vm1, %v1580_v7, %v534_v17  ;;  %v230_v21 = vsel %vm223_vm11, %v226_v49, %v229_v8 }
  0x7e   :  { %v1605_v30 = vsel %vm530_vm9, nan, %v539_v26  ;;  %v801_v43 = vsel %vm799_vm10, %v800_v33, %v798_v6  ;;  %v384_v17 = vsel %vm382_vm14, %v228_v61, %v220_v62  ;;  %vm698_vm10 = vcmp.lt.s32.totalorder %v1417_v34, 0 }
  0x7f   :  { %1196 = vrcp.f32 %v1605_v30  ;;  %v802_v27 = vclz %v801_v43  ;;  %vm1036_vm4 = vweird.f32 %v1605_v30  ;;  %v1042_v15 = vand.u32 2147483648, %v1605_v30 }
  0x80   :  { %v1040_v13 = vand.u32 2147483647, %v1605_v30  ;;  %v820_v7 = vsub.s32 4, %v1593_v44  ;;  %v694_v26 = vsel %vm687_vm7, %v690_v18, %v693_v20  ;;  %v1687_v63 = vsel %vm221_vm0, nan, %v230_v21 }
  0x81   :  { %v1178_v55 = vadd.s32 4294967294, %v802_v27  ;;  %v1043_v24 = vor.u32 1.1754944e-38, %v1042_v15  ;;  %v381_v16 = vsel %vm379_vm6, %v1618_v22, %v225_v46  ;;  %v1023_v33 = vmul.f32 %v1640_v57, %v1654_v14 }
  0x82   :  { %vm1041_vm11 = vcmp.eq.f32.partialorder %v1040_v13, 8.507059e+37  ;;  %v821_v60 = vsel %vm698_vm10, %v820_v7, %v1593_v44  ;;  %v1013_v42 = vmul.f32 %v1605_v30, %v1687_v63  ;;  %v1701_v43 = vmul.f32 2.1367521, %v67_v40 }
  0x83   :  { %vm1179_vm15 = vcmp.lt.s32.totalorder %v1178_v55, 0  ;;  %v1705_v27 = vsel %vm530_vm9, nan, %v694_v26  ;;  %v1020_v52 = vmul.f32 -0.0039, %v1019_v38  ;;  %v73_v62 = vadd.f32 %v1624_v53, %v1622_v35 }
  0x84   :  { %v805_v3 = vsel %vm1179_vm15, 0, %v1178_v55  ;;  %v385_v41 = vsel %vm378_vm3, %v381_v16, %v384_v17  ;;  %vm697_vm12 = vcmp.le.f32.partialorder %v696_v59, 0.7853982  ;;  %v1022_v44 = vmul.f32 0.0039, %v1021_v28 }
  0x85   :  { %v1626_v54 = vpop.eup %1196  ;;  %v806_v45 = vsub.s32 32, %v805_v3  ;;  %v807_v2 = vshll.u32 %v798_v6, %v805_v3  ;;  %v810_v29 = vsub.s32 4294967266, %v805_v3  ;;  %v823_v11 = vsel %vm697_vm12, 0, %v821_v60  ;;  %v50_v16 = vld [vmem:[#allocation2 + $0x10] sm:$0x1] }
  0x86   :  { %v1032_v58 = vmul.f32 %v1626_v54, %v1605_v30  ;;  %vm1037_vm5 = vweird.f32 %v1626_v54  ;;  %v77_v30 = vmul.f32 0.037931036, %v76_v50  ;;  %v1024_v40 = vmul.f32 0.0, %v1023_v33 }
  0x87   :  { %v808_v10 = vshrl.u32 %v790_v56, %v806_v45  ;;  %v811_v12 = vadd.s32 127, %v810_v29  ;;  %vm1668_vm8 = vmor %vm1036_vm4, %vm1037_vm5  ;;  %v1017_v55 = vmul.f32 %v1701_v43, %v1013_v42  ;;  %v1720_v35 = vsel %vm221_vm0, nan, %v385_v41  ;;  %v51_v41 = vld [vmem:[#allocation2 + $0x18] sm:$0x1] }
  0x88   :  { %v1033_v25 = vsub.f32 1.0, %v1032_v58  ;;  %v1025_v59 = vadd.f32 %v1020_v52, %v70_v36  ;;  %v994_v61 = vadd.s32 3, %v823_v11  ;;  %v1027_v19 = vadd.f32 %v1022_v44, %v73_v62  ;;  %v49_v62 = vld [vmem:[#allocation2 + $0x8] sm:$0xc0] }
  0x89   :  { %v809_v5 = vor.u32 %v808_v10, %v807_v2  ;;  %v812_v39 = vshll.u32 %v811_v12, 23  ;;  %v1029_v50 = vadd.f32 %v1024_v40, %v77_v30  ;;  %v1725_v56 = vand.u32 3, %v823_v11 }
  0x8a   :  { %v1034_v9 = vmul.f32 %v1626_v54, %v1033_v25  ;;  %v1183_v3 = vadd.f32 -9.81, %v1017_v55  ;;  %v1026_v0 = vmul.f32 204.08163, %v1025_v59  ;;  %v1728_v2 = vand.u32 3, %v994_v61 }
  0x8b   :  { %v813_v37 = vor.u32 4788187, %v812_v39  ;;  %v816_v23 = vcvt.s32.f32 %v809_v5  ;;  %v1028_v29 = vmul.f32 204.08163, %v1027_v19  ;;  %v1030_v49 = vmul.f32 113.63636, %v1029_v50 }
  0x8c   :  { %v1035_v4 = vadd.f32 %v1626_v54, %v1034_v9  ;;  %v1053_v10 = vmul.f32 %v1687_v63, %v1640_v57  ;;  %vm845_vm9 = vcmp.eq.s32.totalorder %v1725_v56, 2  ;;  %v1101_v13 = vperm.slane %v1183_v3, 1 }
  0x8d   :  { %v814_v32 = vand.u32 2147483647, %v813_v37  ;;  %v1105_v5 = vperm.slane %v1026_v0, 0  ;;  %v1106_v39 = vperm.slane %v1026_v0, 1  ;;  %vm842_vm13 = vcmp.eq.s32.totalorder %v1725_v56, 0 }
  0x8e   :  { %v1039_v6 = vsel %vm1668_vm8, %v1626_v54, %v1035_v4  ;;  %v1100_v4 = vperm.slane %v1183_v3, 0  ;;  %v1054_v48 = vmul.f32 %v1720_v35, %v1646_v47  ;;  %v1110_v17 = vperm.slane %v1028_v29, 0 }
  0x8f   :  { %v817_v22 = vmul.f32 %v816_v23, %v814_v32  ;;  %v1044_v54 = vsel %vm1041_vm11, %v1043_v24, %v1039_v6  ;;  %v1111_v7 = vperm.slane %v1028_v29, 1  ;;  %vm841_vm14 = vcmp.lt.s32.totalorder %v1725_v56, 2  ;;  %v48_v6 = vld [vmem:[#allocation2] sm:$0xc0] }
  0x90   :  { %v1046_v58 = vmul.f32 %v1044_v54, %v1705_v27  ;;  %v1056_v21 = vmul.f32 %v1044_v54, %v1720_v35  ;;  %v1115_v38 = vperm.slane %v1030_v49, 0  ;;  %v1116_v24 = vperm.slane %v1030_v49, 1 }
  0x91   :  { %v818_v1 = vxor.u32 2147483648, %v817_v22  ;;  %vm1065_vm15 = vcmask 1041408   ;;  %vm1134_vm0 = vcmask 1040384   ;;  %v1058_v42 = vmul.f32 %v1044_v54, %v1687_v63 }
  0x92   :  { %v1047_v25 = vmul.f32 %v1046_v58, %v1720_v35  ;;  %v1050_v15 = vmul.f32 %v1046_v58, %v1687_v63  ;;  %v1135_v36 = vsel %vm1134_vm0, %v1100_v4, %v1105_v5  ;;  %v1136_v60 = vsel %vm1134_vm0, %v1101_v13, %v1106_v39 }
  0x93   :  { %v819_v51 = vsel %vm698_vm10, %v818_v1, %v817_v22  ;;  %vm1119_vm1 = vcmask 1042432   ;;  %v1137_v22 = vsel %vm1065_vm15, %v1135_v36, %v1110_v17  ;;  %v1138_v52 = vsel %vm1065_vm15, %v1136_v60, %v1111_v7 }
  0x94   :  { %v822_v53 = vsel %vm697_vm12, %v1417_v34, %v819_v51  ;;  %v1048_v12 = vmul.f32 %v1047_v25, %v1640_v57  ;;  %v1051_v28 = vmul.f32 %v1050_v15, %v1646_v47  ;;  %v1139_v30 = vsel %vm1119_vm1, %v1137_v22, %v1115_v38 }
  0x95   :  { %v824_v31 = vmul.f32 %v822_v53, %v822_v53  ;;  %v1140_v1 = vsel %vm1119_vm1, %v1138_v52, %v1116_v24  ;;  %vm997_vm2 = vcmp.eq.s32.totalorder %v1728_v2, 0  ;;  %vm1000_vm3 = vcmp.eq.s32.totalorder %v1728_v2, 2  ;;  %1143 = vst [vmem:[#allocation7 + $0x10] sm:$0xf] %v1139_v30 }
  0x96   :  { %v1049_v26 = vadd.f32 %v1048_v12, %v1654_v14  ;;  %v1066_v11 = vrot.slane %v48_v6, 6  ;;  %v1067_v40 = vrot.slane %v50_v16, 6  ;;  %vm996_vm4 = vcmp.lt.s32.totalorder %v1728_v2, 2  ;;  %1144 = vst [vmem:[#allocation7 + $0x18] sm:$0xf] %v1140_v1 }
  0x97   :  { %v825_v46 = vmul.f32 -0.001358992, %v824_v31  ;;  %v832_v45 = vmul.f32 -0.00019511016, %v824_v31  ;;  %v1055_v51 = vsub.f32 %v1053_v10, %v1054_v48  ;;  %v1057_v59 = vmul.f32 %v1056_v21, %v1640_v57 }
  0x98   :  { %v1052_v58 = vadd.f32 %v1051_v28, %v1049_v26  ;;  %v1069_v61 = vrot.slane %v49_v62, 6  ;;  %v1070_v19 = vrot.slane %v51_v41, 6  ;;  %v1059_v25 = vmul.f32 %v1058_v42, %v1646_v47 }
  0x99   :  { %v826_v8 = vadd.f32 0.041655596, %v825_v46  ;;  %v833_v9 = vadd.f32 0.008332121, %v832_v45  ;;  %vm839_vm5 = vweird.f32 %v1417_v34  ;;  %v1068_v46 = vsel %vm1065_vm15, %v1066_v11, %v1067_v40 }
  0x9a   :  { %v1075_v0 = vperm.slane %v1052_v58, 0  ;;  %v1076_v29 = vperm.slane %v1052_v58, 1  ;;  %v1071_v34 = vsel %vm1065_vm15, %v1069_v61, %v1070_v19  ;;  %v1060_v12 = vadd.f32 %v1059_v25, %v1057_v59 }
  0x9b   :  { %v827_v18 = vmul.f32 %v826_v8, %v824_v31  ;;  %v834_v20 = vmul.f32 %v833_v9, %v824_v31  ;;  %v1080_v9 = vperm.slane %v1055_v51, 0  ;;  %v1081_v15 = vperm.slane %v1055_v51, 1 }
  0x9c   :  { %v1120_v56 = vsel %vm1119_vm1, %v1068_v46, %v1075_v0  ;;  %v1121_v5 = vsel %vm1119_vm1, %v1071_v34, %v1076_v29  ;;  %vm1122_vm6 = vcmask 1043456   ;;  %v1085_v48 = vperm.slane %v1060_v12, 0 }
  0x9d   :  { %v828_v37 = vadd.f32 -0.4999988, %v827_v18  ;;  %v835_v23 = vadd.f32 -0.16666654, %v834_v20  ;;  %v1086_v21 = vperm.slane %v1060_v12, 1  ;;  %vm1125_vm7 = vcmask 1044480  }
  0x9e   :  { %vm1128_vm8 = vcmask 1045504   ;;  %vm1131_vm10 = vcmask 1046528  }
  0x9f   :  { %v829_v32 = vmul.f32 %v828_v37, %v824_v31  ;;  %v836_v33 = vmul.f32 %v835_v23, %v824_v31  ;;  %v1124_v37 = vsel %vm1122_vm6, %v1121_v5, %v1081_v15 }
  0xa0   :  { %v1127_v26 = vsel %vm1125_vm7, %v1124_v37, %v1086_v21 }
  0xa1   :  { %v830_v14 = vadd.f32 1.0, %v829_v32  ;;  %v837_v44 = vadd.f32 1.0, %v836_v33 }
  0xa3   :  { %v838_v54 = vmul.f32 %v837_v44, %v822_v53  ;;  %v846_v55 = vxor.u32 2147483648, %v830_v14  ;;  %v1009_v53 = vmul.f32 %v1705_v27, %v1687_v63 }
  0xa5   :  { %v843_v31 = vxor.u32 2147483648, %v838_v54  ;;  %v847_v50 = vsel %vm845_vm9, %v846_v55, %v838_v54  ;;  %v1002_v3 = vsel %vm1000_vm3, %v846_v55, %v838_v54 }
  0xa7   :  { %v844_v45 = vsel %vm842_vm13, %v830_v14, %v843_v31  ;;  %v999_v57 = vsel %vm997_vm2, %v830_v14, %v843_v31 }
  0xa8   :  { %v848_v8 = vsel %vm841_vm14, %v844_v45, %v847_v50  ;;  %v1003_v47 = vsel %vm996_vm4, %v999_v57, %v1002_v3 }
  0xa9   :  { %v849_v49 = vsel %vm839_vm5, nan, %v848_v8  ;;  %v1004_v10 = vsel %vm839_vm5, nan, %v1003_v47 }
  0xaa   :  { %v1005_v4 = vmul.f32 %v849_v49, %v1687_v63  ;;  %v1007_v13 = vmul.f32 %v1004_v10, %v1720_v35  ;;  %v1010_v18 = vmul.f32 %v1009_v53, %v1004_v10  ;;  %v1011_v20 = vmul.f32 %v849_v49, %v1720_v35 }
  0xab   :  { %v1123_v63 = vsel %vm1122_vm6, %v1120_v56, %v1080_v9 }
  0xac   :  { %v1006_v2 = vmul.f32 %v1005_v4, %v1705_v27  ;;  %v1012_v39 = vsub.f32 %v1010_v18, %v1011_v20  ;;  %v1126_v24 = vsel %vm1125_vm7, %v1123_v63, %v1085_v48 }
  0xae   :  { %v1008_v17 = vadd.f32 %v1007_v13, %v1006_v2  ;;  %v1016_v7 = vmul.f32 %v1701_v43, %v1012_v39 }
  0xb0   :  { %v1015_v23 = vmul.f32 %v1701_v43, %v1008_v17  ;;  %v1095_v35 = vperm.slane %v1016_v7, 0  ;;  %v1096_v38 = vperm.slane %v1016_v7, 1 }
  0xb2   :  { %v1090_v28 = vperm.slane %v1015_v23, 0  ;;  %v1091_v6 = vperm.slane %v1015_v23, 1 }
  0xb4   :  { %v1129_v27 = vsel %vm1128_vm8, %v1126_v24, %v1090_v28  ;;  %v1130_v16 = vsel %vm1128_vm8, %v1127_v26, %v1091_v6 }
  0xb5   :  { %v1132_v32 = vsel %vm1131_vm10, %v1129_v27, %v1095_v35  ;;  %v1133_v33 = vsel %vm1131_vm10, %v1130_v16, %v1096_v38 }
  0xb6   :  { %1141 = vst [vmem:[#allocation7] sm:$0xff] %v1132_v32 }
  0xb7   :  { %1142 = vst [vmem:[#allocation7 + $0x8] sm:$0xff] %v1133_v33 }
  0xb8   :  { %1157 = dma.vmem_to_hbm [thread:$0]  %s1150_s1, 512, %s1152_s23, [#allocation4], %s1277_s17, %s1277_s17, %s1278_s18  }
  0xb9   :  { %1274 = dma.done.wait [#allocation4], 512  }
  0xba   :  { %1275 = vsyncadd [#allocation4], 4294966784 }
  0xbb   :  { %1162 = vsyncpa [#allocation3], 1 }
  0xbc   :  { %1163 = vsyncpa [#allocation6], 1 }
  0xbd   :  { %1164 = vsyncpa [#allocation4], 1 }

</bundles_post_ra>
